<compile_context>
chip_gen: v7x
topology: tpu7x:2x2x1
jax: 0.10.0
libtpu: 0.0.40
codegen_flags: <defaults>
</compile_context>

<pallas_src>
import jax
import jax.numpy as jnp
from jax.experimental import pallas as pl
from jax.experimental.pallas import tpu as pltpu

N_EMBD = 32
HIDDEN = 4 * N_EMBD          # 128
PACK = 4                     # original rows packed per 128-lane row
P_IN = PACK * N_EMBD         # 128  packed input/output width
P_HID = PACK * HIDDEN        # 512  packed hidden width

TMP_MAX = 1024               # packed rows per grid step (= 4096 original rows)
_CHUNK = 256                 # packed rows per inner compute chunk


def _round_up(x, m):
    return ((x + m - 1) // m) * m


def _ffn_kernel(x_ref, w1_ref, b1_ref, w2_ref, b2_ref, o_ref):
    # x_ref: (tm, 128) f32   w1_ref: (128, 512) bf16   b1_ref: (1, 512) f32
    # w2_ref: (512, 128) bf16  b2_ref: (1, 128) f32    o_ref: (tm, 128) f32
    w1 = w1_ref[...]
    b1 = b1_ref[...]
    w2 = w2_ref[...]
    b2 = b2_ref[...]

    def compute(x):
        # First linear: bf16 operands on the MXU, f32 accumulation.
        h = jnp.dot(x.astype(jnp.bfloat16), w1,
                    preferred_element_type=jnp.float32)
        # Bias + ReLU in f32 on the VPU ((1,512) broadcasts over rows).
        h = jnp.maximum(h + b1, 0.0)
        # Second linear.
        y = jnp.dot(h.astype(jnp.bfloat16), w2,
                    preferred_element_type=jnp.float32)
        return (y + b2).astype(o_ref.dtype)

    tm = x_ref.shape[0]
    if tm > _CHUNK and tm % _CHUNK == 0:
        # Chunk the compute (not the DMA tile) to bound live ranges.
        def body(c, carry):
            start = pl.multiple_of(c * _CHUNK, _CHUNK)
            o_ref[pl.ds(start, _CHUNK), :] = compute(x_ref[pl.ds(start, _CHUNK), :])
            return carry
        jax.lax.fori_loop(0, tm // _CHUNK, body, 0, unroll=True)
    else:
        o_ref[...] = compute(x_ref[...])


def _choose_packed_tile(mp):
    """Packed-row tile: big enough to amortize per-step overhead, keeps >=4
    grid steps when there is enough work (v7x megacore), multiple of 8."""
    if mp <= 8:
        return mp                                    # single full block
    tile = _round_up(pl.cdiv(mp, 4), 8)              # aim for >= 4 grid steps
    if tile >= _CHUNK:
        tile = (tile // _CHUNK) * _CHUNK             # align to compute chunk
    return min(tile, TMP_MAX)


def feedforward_pallas(x2d, w1_bd, b1_bd, w2_bd, b2_bd):
    """x2d: (M, n_embd) float32. Returns (M, n_embd) float32."""
    M, D = x2d.shape
    assert D == N_EMBD

    # Lane-pack PACK consecutive rows into one 128-lane row.  Pad only to a
    # multiple of PACK (no-op in the common case) -- NOT to a tile multiple.
    m4 = _round_up(M, PACK)
    if m4 != M:
        x2d = jnp.pad(x2d, ((0, m4 - M), (0, 0)))
    mp = m4 // PACK
    xp = x2d.reshape(mp, P_IN)                        # free row-major reshape

    tm = _choose_packed_tile(mp)
    grid = (pl.cdiv(mp, tm),)                         # partial last block OK

    flops = 2 * mp * (P_IN * P_HID + P_HID * P_IN)
    bytes_accessed = (
        mp * P_IN * 4 * 2                             # x in + y out (f32)
        + (P_IN * P_HID + P_HID * P_IN) * 2           # bf16 block-diag weights
        + (P_HID + P_IN) * 4)                         # f32 biases

    yp = pl.pallas_call(
        _ffn_kernel,
        out_shape=jax.ShapeDtypeStruct((mp, P_IN), x2d.dtype),
        grid_spec=pltpu.PrefetchScalarGridSpec(
            num_scalar_prefetch=0,
            grid=grid,
            in_specs=[
                pl.BlockSpec((tm, P_IN), lambda i: (i, 0)),      # x: row-tiled
                pl.BlockSpec((P_IN, P_HID), lambda i: (0, 0)),   # W1_bd resident
                pl.BlockSpec((1, P_HID), lambda i: (0, 0)),      # b1 resident
                pl.BlockSpec((P_HID, P_IN), lambda i: (0, 0)),   # W2_bd resident
                pl.BlockSpec((1, P_IN), lambda i: (0, 0)),       # b2 resident
            ],
            out_specs=pl.BlockSpec((tm, P_IN), lambda i: (i, 0)),
        ),
        compiler_params=pltpu.CompilerParams(
            dimension_semantics=("parallel",)),       # rows independent
        cost_estimate=pl.CostEstimate(
            flops=flops, transcendentals=0, bytes_accessed=bytes_accessed),
    )(xp, w1_bd, b1_bd, w2_bd, b2_bd)

    y = yp.reshape(m4, N_EMBD)
    return y[:M] if m4 != M else y


class FeedForward:
    """JAX/Pallas port of the PyTorch FeedForward module."""

    def __init__(self, n_embd, key):
        assert n_embd == N_EMBD
        k1, k2, k3, k4 = jax.random.split(key, 4)
        hidden = 4 * n_embd
        # PyTorch nn.Linear default init: U(-1/sqrt(fan_in), 1/sqrt(fan_in)).
        bound1 = 1.0 / jnp.sqrt(n_embd)
        bound2 = 1.0 / jnp.sqrt(hidden)
        # Stored transposed vs PyTorch: (in_features, out_features).
        self.w1 = jax.random.uniform(k1, (n_embd, hidden), jnp.float32,
                                     -bound1, bound1)
        self.b1 = jax.random.uniform(k2, (1, hidden), jnp.float32,
                                     -bound1, bound1)
        self.w2 = jax.random.uniform(k3, (hidden, n_embd), jnp.float32,
                                     -bound2, bound2)
        self.b2 = jax.random.uniform(k4, (1, n_embd), jnp.float32,
                                     -bound2, bound2)
        # Lane-packing prep (done once, not per call): block-diagonal weights
        # so PACK original rows share one 128-lane row, in bf16 for the MXU.
        self.w1_bd = jax.scipy.linalg.block_diag(
            *([self.w1] * PACK)).astype(jnp.bfloat16)        # (128, 512)
        self.w2_bd = jax.scipy.linalg.block_diag(
            *([self.w2] * PACK)).astype(jnp.bfloat16)        # (512, 128)
        self.b1_bd = jnp.tile(self.b1, (1, PACK))            # (1, 512) f32
        self.b2_bd = jnp.tile(self.b2, (1, PACK))            # (1, 128) f32

    def __call__(self, x):
        # x: (..., n_embd) -> (..., n_embd), matching the PyTorch forward.
        lead = x.shape[:-1]
        x2d = x.reshape(-1, x.shape[-1])
        y2d = feedforward_pallas(x2d, self.w1_bd, self.b1_bd,
                                 self.w2_bd, self.b2_bd)
        return y2d.reshape(*lead, x.shape[-1])


if __name__ == "__main__":
    key = jax.random.PRNGKey(0)
    kp, kx, kx2, kx3 = jax.random.split(key, 4)

    ffn = FeedForward(N_EMBD, kp)

    def ref_fn(x):
        x2d = x.reshape(-1, N_EMBD)
        r = jnp.maximum(x2d @ ffn.w1 + ffn.b1, 0.0) @ ffn.w2 + ffn.b2
        return r.reshape(x.shape)

    # Main check: batch=2, seq=8 (M=16 -> 4 packed rows, single block).
    batch, seq = 2, 8
    x = jax.random.normal(kx, (batch, seq, N_EMBD), dtype=jnp.float32)
    y = jax.block_until_ready(ffn(x))
    assert y.shape == (batch, seq, N_EMBD)
    assert y.dtype == jnp.float32
    # bf16 MXU operands with f32 accumulation -> loosened tolerance vs f32 ref.
    assert jnp.allclose(y, ref_fn(x), atol=2e-2, rtol=2e-2)

    # M=15: exercises the tiny pad-to-multiple-of-4 path.
    x_tail = jax.random.normal(kx2, (3, 5, N_EMBD), dtype=jnp.float32)
    y_tail = jax.block_until_ready(ffn(x_tail))
    assert y_tail.shape == (3, 5, N_EMBD)
    assert jnp.allclose(y_tail, ref_fn(x_tail), atol=2e-2, rtol=2e-2)

    # Larger M: multi-step grid, chunked inner loop, partial last block.
    x_big = jax.random.normal(kx3, (8, 1030, N_EMBD), dtype=jnp.float32)
    y_big = jax.block_until_ready(ffn(x_big))
    assert y_big.shape == (8, 1030, N_EMBD)
    assert jnp.allclose(y_big, ref_fn(x_big), atol=2e-2, rtol=2e-2)

    print("KERNEL_OK")
</pallas_src>

<mosaic_0001>
module attributes {stable_mosaic.version = 11 : i64} {
  func.func @_ffn_kernel(%arg0: i32, %arg1: memref<4x128xf32, #tpu.memory_space<vmem>>, %arg2: memref<128x512xbf16, #tpu.memory_space<vmem>>, %arg3: memref<1x512xf32, #tpu.memory_space<vmem>>, %arg4: memref<512x128xbf16, #tpu.memory_space<vmem>>, %arg5: memref<1x128xf32, #tpu.memory_space<vmem>>, %arg6: memref<4x128xf32, #tpu.memory_space<vmem>>) attributes {dimension_semantics = [#tpu.dimension_semantics<parallel>], iteration_bounds = array<i64: 1>, scalar_prefetch = 0 : i64, scratch_operands = 0 : i64, tpu.core_type = #tpu.core_type<tc>, window_params = [{transform_indices = @transform_0, window_bounds = array<i64: 4, 128>}, {pipeline_mode = #tpu.pipeline_mode<synchronous>, transform_indices = @transform_1, window_bounds = array<i64: 128, 512>}, {pipeline_mode = #tpu.pipeline_mode<synchronous>, transform_indices = @transform_2, window_bounds = array<i64: 1, 512>}, {pipeline_mode = #tpu.pipeline_mode<synchronous>, transform_indices = @transform_3, window_bounds = array<i64: 512, 128>}, {pipeline_mode = #tpu.pipeline_mode<synchronous>, transform_indices = @transform_4, window_bounds = array<i64: 1, 128>}, {transform_indices = @transform_5, window_bounds = array<i64: 4, 128>}]} {
    %c0 = arith.constant 0 : index
    %c0_0 = arith.constant 0 : index
    %0 = vector.load %arg2[%c0, %c0_0] : memref<128x512xbf16, #tpu.memory_space<vmem>>, vector<128x512xbf16>
    %c0_1 = arith.constant 0 : index
    %c0_2 = arith.constant 0 : index
    %1 = vector.load %arg3[%c0_1, %c0_2] : memref<1x512xf32, #tpu.memory_space<vmem>>, vector<1x512xf32>
    %c0_3 = arith.constant 0 : index
    %c0_4 = arith.constant 0 : index
    %2 = vector.load %arg4[%c0_3, %c0_4] : memref<512x128xbf16, #tpu.memory_space<vmem>>, vector<512x128xbf16>
    %c0_5 = arith.constant 0 : index
    %c0_6 = arith.constant 0 : index
    %3 = vector.load %arg5[%c0_5, %c0_6] : memref<1x128xf32, #tpu.memory_space<vmem>>, vector<1x128xf32>
    %c0_7 = arith.constant 0 : index
    %c0_8 = arith.constant 0 : index
    %4 = vector.load %arg1[%c0_7, %c0_8] : memref<4x128xf32, #tpu.memory_space<vmem>>, vector<4x128xf32>
    %5 = arith.truncf %4 : vector<4x128xf32> to vector<4x128xbf16>
    %cst = arith.constant dense<0.000000e+00> : vector<4x512xf32>
    %6 = tpu.matmul %5, %0, %cst {dimension_numbers = #tpu.dot_dimension_numbers<[1], [0], [0], [1], [0, 0, 1, 1], [], []>} : vector<4x128xbf16>, vector<128x512xbf16>, vector<4x512xf32> -> vector<4x512xf32>
    %7 = vector.broadcast %1 : vector<1x512xf32> to vector<4x512xf32>
    %8 = arith.addf %6, %7 : vector<4x512xf32>
    %cst_9 = arith.constant 0.000000e+00 : f32
    %9 = vector.broadcast %cst_9 : f32 to vector<4x512xf32>
    %10 = arith.maximumf %8, %9 : vector<4x512xf32>
    %11 = arith.truncf %10 : vector<4x512xf32> to vector<4x512xbf16>
    %cst_10 = arith.constant dense<0.000000e+00> : vector<4x128xf32>
    %12 = tpu.matmul %11, %2, %cst_10 {dimension_numbers = #tpu.dot_dimension_numbers<[1], [0], [0], [1], [0, 0, 1, 1], [], []>} : vector<4x512xbf16>, vector<512x128xbf16>, vector<4x128xf32> -> vector<4x128xf32>
    %13 = vector.broadcast %3 : vector<1x128xf32> to vector<4x128xf32>
    %14 = arith.addf %12, %13 : vector<4x128xf32>
    %c0_11 = arith.constant 0 : index
    %c0_12 = arith.constant 0 : index
    %15 = vector.load %arg6[%c0_11, %c0_12] : memref<4x128xf32, #tpu.memory_space<vmem>>, vector<4x128xf32>
    tpu.vector_store %arg6[%c0_11, %c0_12], %14 {strides = array<i32>} : memref<4x128xf32, #tpu.memory_space<vmem>>, vector<4x128xf32>,
    return
  }
  func.func @transform_0(%arg0: i32) -> (i32, i32) {
    %c0_i32 = arith.constant 0 : i32
    %c0_i32_0 = arith.constant 0 : i32
    return %arg0, %c0_i32 : i32, i32
  }
  func.func @transform_1(%arg0: i32) -> (i32, i32) {
    %c0_i32 = arith.constant 0 : i32
    %c0_i32_0 = arith.constant 0 : i32
    %c0_i32_1 = arith.constant 0 : i32
    return %c0_i32, %c0_i32_0 : i32, i32
  }
  func.func @transform_2(%arg0: i32) -> (i32, i32) {
    %c0_i32 = arith.constant 0 : i32
    %c0_i32_0 = arith.constant 0 : i32
    %c0_i32_1 = arith.constant 0 : i32
    return %c0_i32, %c0_i32_0 : i32, i32
  }
  func.func @transform_3(%arg0: i32) -> (i32, i32) {
    %c0_i32 = arith.constant 0 : i32
    %c0_i32_0 = arith.constant 0 : i32
    %c0_i32_1 = arith.constant 0 : i32
    return %c0_i32, %c0_i32_0 : i32, i32
  }
  func.func @transform_4(%arg0: i32) -> (i32, i32) {
    %c0_i32 = arith.constant 0 : i32
    %c0_i32_0 = arith.constant 0 : i32
    %c0_i32_1 = arith.constant 0 : i32
    return %c0_i32, %c0_i32_0 : i32, i32
  }
  func.func @transform_5(%arg0: i32) -> (i32, i32) {
    %c0_i32 = arith.constant 0 : i32
    %c0_i32_0 = arith.constant 0 : i32
    return %arg0, %c0_i32 : i32, i32
  }
}

</mosaic_0001>

<bundles_post_ra>
// kernel: tpu_custom_call.1
= control target key start
LH: loop header
LB: loop body
LE: loop exit
PB: predicated region body
PF: predicated region fallthrough
CT: control target
= control target key end

     0   :  { %10 = vsyncpa [#allocation3], 0  ;;  %s1112_s0 = inlined_call_operand.hbm [shape: f32[4,128], index: 0, kind: input, shape index: {}]   ;;  %s1113_s1 = inlined_call_operand.hbm [shape: bf16[128,512], index: 1, kind: input, shape index: {}]   ;;  %s1114_s2 = inlined_call_operand.vmem [shape: f32[1,512], index: 2, kind: input, shape index: {}]   ;;  %s1115_s3 = inlined_call_operand.hbm [shape: bf16[512,128], index: 3, kind: input, shape index: {}]   ;;  %s1116_s4 = inlined_call_operand.vmem [shape: f32[1,128], index: 4, kind: input, shape index: {}]   ;;  %s1117_s5 = inlined_call_operand.hbm [shape: f32[4,128], index: 5, kind: output, shape index: {}]  }
   0x1   :  { %11 = vsyncpa [#allocation6], 0 }
   0x2   :  { %12 = vsyncpa [#allocation4], 0  ;;  %s1019_s18 = smov [#allocation5]   ;;  %s925_s22 = scalar_lea.hbm %s1113_s1, 4096 }
   0x3   :  { %s28_s19 = sshll.u32 %s1019_s18, 4  ;;  %p926_p0 = scmp.ne.s32.totalorder %s1113_s1, %s925_s22  ;;  %s29_s19 = int_to_ptr.vmem [resolvable:$true] %s28_s19 }
   0x4   :  { %p929_p1 = scmp.lt.u32.totalorder %s925_s22, %s1113_s1 }
   0x6   :  { %p931_p2 = pnand %p929_p1, %p926_p0 }
   0x8   :  { %934 = shalt.err (!%p931_p2)
}
   0x9   :  { %s935_s27 = scalar_lea.vmem %s29_s19, 4096  ;;  %p940_p4 = scmp.lt.s32.totalorder %s29_s19, %s29_s19 }
   0xa   :  { %p936_p3 = scmp.ne.s32.totalorder %s29_s19, %s935_s27  ;;  %p941_p5 = scmp.lt.s32.totalorder %s935_s27, %s935_s27 }
   0xc   :  { %p942_p6 = por %p941_p5, %p940_p4 }
   0xe   :  { %p943_p7 = pnand %p942_p6, %p936_p3 }
  0x10   :  { %946 = shalt.err (!%p943_p7)
}
  0x11   :  { %s1020_s28 = smov 256   ;;  %s1021_s29 = smov 16  }
  0x12   :  { %34 = dma.hbm_to_vmem [thread:$0]  %s1113_s1, 4096, %s29_s19, [#allocation6], %s1020_s28, %s1020_s28, %s1021_s29  }
  0x13   :  { %s1022_s7 = smov [#allocation2]   ;;  %s1023_s9 = smov [#allocation7]  }
  0x14   :  { %s19_s8 = sshll.u32 %s1022_s7, 4  ;;  %s42_s10 = sshll.u32 %s1023_s9, 4  ;;  %s20_s8 = int_to_ptr.vmem [resolvable:$true] %s19_s8  ;;  %s43_s10 = int_to_ptr.vmem [resolvable:$true] %s42_s10 }
  0x15   :  { %s947_s13 = scalar_lea.hbm %s1112_s0, 64 }
  0x16   :  { %p948_p8 = scmp.ne.s32.totalorder %s1112_s0, %s947_s13  ;;  %p951_p9 = scmp.lt.u32.totalorder %s947_s13, %s1112_s0 }
  0x18   :  { %p953_p10 = pnand %p951_p9, %p948_p8 }
  0x1a   :  { %956 = shalt.err (!%p953_p10)
}
  0x1b   :  { %s957_s1 = scalar_lea.vmem %s20_s8, 64  ;;  %p962_p12 = scmp.lt.s32.totalorder %s20_s8, %s20_s8 }
  0x1c   :  { %p958_p11 = scmp.ne.s32.totalorder %s20_s8, %s957_s1  ;;  %p963_p13 = scmp.lt.s32.totalorder %s957_s1, %s957_s1 }
  0x1e   :  { %p964_p0 = por %p963_p13, %p962_p12 }
  0x20   :  { %p965_p1 = pnand %p964_p0, %p958_p11 }
  0x22   :  { %968 = shalt.err (!%p965_p1)
}
  0x23   :  { %22 = dma.hbm_to_vmem [thread:$0]  %s1112_s0, 64, %s20_s8, [#allocation3]  }
  0x24   :  { %s969_s22 = scalar_lea.hbm %s1115_s3, 4096 }
  0x25   :  { %p970_p2 = scmp.ne.s32.totalorder %s1115_s3, %s969_s22  ;;  %p973_p3 = scmp.lt.u32.totalorder %s969_s22, %s1115_s3 }
  0x27   :  { %p975_p4 = pnand %p973_p3, %p970_p2 }
  0x29   :  { %978 = shalt.err (!%p975_p4)
}
  0x2a   :  { %s979_s27 = scalar_lea.vmem %s43_s10, 4096  ;;  %p984_p6 = scmp.lt.s32.totalorder %s43_s10, %s43_s10 }
  0x2b   :  { %p980_p5 = scmp.ne.s32.totalorder %s43_s10, %s979_s27  ;;  %p985_p7 = scmp.lt.s32.totalorder %s979_s27, %s979_s27 }
  0x2d   :  { %p986_p8 = por %p985_p7, %p984_p6 }
  0x2f   :  { %p987_p9 = pnand %p986_p8, %p980_p5 }
  0x31   :  { %990 = shalt.err (!%p987_p9)
}
  0x32   :  { %s1024_s0 = smov 64   ;;  %s1025_s28 = smov 4  }
  0x33   :  { %48 = dma.hbm_to_vmem [thread:$0]  %s1115_s3, 4096, %s43_s10, [#allocation6], %s1024_s0, %s1024_s0, %s1025_s28  }
  0x34   :  { %1013 = dma.done.wait [#allocation3], 64  }
  0x35   :  { %1014 = vsyncadd [#allocation3], 4294967232 }
  0x36   :  { %1015 = dma.done.wait [#allocation6], 8192  }
  0x37   :  { %1016 = vsyncadd [#allocation6], 4294959104  ;;  %v1026_v0 = vmov 0   ;;  %v845_v1 = vld [vmem:[#allocation5 + $0x4] ss:$16 sps:$4 sm:$0xff]   ;;  %v897_v39 = vld [vmem:[#allocation7 + $0x48] sm:$0xff]  }
  0x38   :  { %374 = vmatprep.mubr.bf16.mxu0 %v1026_v0  ;;  %415 = vmatprep.mubr.bf16.mxu1 %v1026_v0  ;;  %v847_v2 = vld [vmem:[#allocation5 + $0xc] ss:$16 sps:$4 sm:$0xff]   ;;  %v849_v3 = vld [vmem:[#allocation5] ss:$16 sps:$4 sm:$0xff]   ;;  %v850_v4 = vld [vmem:[#allocation5 + $0x8] ss:$16 sps:$4 sm:$0xff]  }
  0x39   :  { %342 = vmatprep.subr.bf16.mxu0 %v845_v1  ;;  %383 = vmatprep.subr.bf16.mxu1 %v847_v2  ;;  %v851_v5 = vld [vmem:[#allocation5 + $0x24] ss:$16 sps:$4 sm:$0xff]   ;;  %v853_v6 = vld [vmem:[#allocation5 + $0x2c] ss:$16 sps:$4 sm:$0xff]   ;;  %v855_v7 = vld [vmem:[#allocation5 + $0x20] ss:$16 sps:$4 sm:$0xff]  }
  0x3a   :  { %343 = vmatpush1.bf16.msra.mxu0 %v849_v3  ;;  %384 = vmatpush1.bf16.msra.mxu1 %v850_v4  ;;  %v856_v8 = vld [vmem:[#allocation5 + $0x28] ss:$16 sps:$4 sm:$0xff]   ;;  %v857_v9 = vld [vmem:[#allocation5 + $0x44] ss:$16 sps:$4 sm:$0xff]   ;;  %v859_v10 = vld [vmem:[#allocation5 + $0x4c] ss:$16 sps:$4 sm:$0xff]   ;;  %v162_v3 = vlaneseq }
  0x3b   :  { %344 = vmatprep.subr.bf16.mxu0 %v851_v5  ;;  %385 = vmatprep.subr.bf16.mxu1 %v853_v6  ;;  %v861_v11 = vld [vmem:[#allocation5 + $0x40] ss:$16 sps:$4 sm:$0xff]   ;;  %v862_v12 = vld [vmem:[#allocation5 + $0x48] ss:$16 sps:$4 sm:$0xff]   ;;  %v863_v13 = vld [vmem:[#allocation5 + $0x64] ss:$16 sps:$4 sm:$0xff]  }
  0x3c   :  { %v865_v14 = vld [vmem:[#allocation5 + $0x6c] ss:$16 sps:$4 sm:$0xff]   ;;  %v867_v15 = vld [vmem:[#allocation5 + $0x60] ss:$16 sps:$4 sm:$0xff]   ;;  %v868_v16 = vld [vmem:[#allocation5 + $0x68] ss:$16 sps:$4 sm:$0xff]  }
  0x3d   :  { %v869_v17 = vld [vmem:[#allocation5 + $0x84] ss:$16 sps:$4 sm:$0xff]   ;;  %v871_v18 = vld [vmem:[#allocation5 + $0x8c] ss:$16 sps:$4 sm:$0xff]   ;;  %v873_v19 = vld [vmem:[#allocation5 + $0x80] ss:$16 sps:$4 sm:$0xff]  }
  0x3e   :  { %345 = vmatpush1.bf16.msra.mxu0 %v855_v7  ;;  %386 = vmatpush1.bf16.msra.mxu1 %v856_v8  ;;  %v874_v20 = vld [vmem:[#allocation5 + $0x88] ss:$16 sps:$4 sm:$0xff]   ;;  %v875_v21 = vld [vmem:[#allocation5 + $0xa4] ss:$16 sps:$4 sm:$0xff]   ;;  %v877_v22 = vld [vmem:[#allocation5 + $0xac] ss:$16 sps:$4 sm:$0xff]  }
  0x3f   :  { %346 = vmatprep.subr.bf16.mxu0 %v857_v9  ;;  %387 = vmatprep.subr.bf16.mxu1 %v859_v10  ;;  %v879_v23 = vld [vmem:[#allocation5 + $0xa0] ss:$16 sps:$4 sm:$0xff]   ;;  %v880_v24 = vld [vmem:[#allocation5 + $0xa8] ss:$16 sps:$4 sm:$0xff]   ;;  %v881_v25 = vld [vmem:[#allocation5 + $0xc4] ss:$16 sps:$4 sm:$0xff]  }
  0x40   :  { %v883_v26 = vld [vmem:[#allocation5 + $0xcc] ss:$16 sps:$4 sm:$0xff]   ;;  %v885_v27 = vld [vmem:[#allocation5 + $0xc0] ss:$16 sps:$4 sm:$0xff]   ;;  %v886_v28 = vld [vmem:[#allocation5 + $0xc8] ss:$16 sps:$4 sm:$0xff]  }
  0x41   :  { %v887_v29 = vld [vmem:[#allocation5 + $0xe4] ss:$16 sps:$4 sm:$0xff]   ;;  %v889_v30 = vld [vmem:[#allocation5 + $0xec] ss:$16 sps:$4 sm:$0xff]   ;;  %v891_v31 = vld [vmem:[#allocation5 + $0xe0] ss:$16 sps:$4 sm:$0xff]  }
  0x42   :  { %347 = vmatpush1.bf16.msra.mxu0 %v861_v11  ;;  %388 = vmatpush1.bf16.msra.mxu1 %v862_v12  ;;  %v892_v32 = vld [vmem:[#allocation5 + $0xe8] ss:$16 sps:$4 sm:$0xff]   ;;  %v159_v33 = vld [vmem:[#allocation2] sm:$0xf]  ;;  %v893_v34 = vld [vmem:[#allocation7 + $0x40] sm:$0xff]   ;;  %v163_v4 = vshrl.u32 %v162_v3, 7 }
  0x43   :  { %348 = vmatprep.subr.bf16.mxu0 %v863_v13  ;;  %389 = vmatprep.subr.bf16.mxu1 %v865_v14  ;;  %v894_v35 = vld [vmem:[#allocation7 + $0xc0] sm:$0xff]   ;;  %v160_v37 = vpack.c.bf16 %v159_v33, %v159_v33  ;;  %v898_v40 = vld [vmem:[#allocation7 + $0xc8] sm:$0xff]   ;;  %v901_v43 = vld [vmem:[#allocation7 + $0x50] sm:$0xff]   ;;  %s1027_s8 = smov [#allocation8]  }
  0x44   :  { %v895_v36 = vld [vmem:[#allocation7] sm:$0xff]   ;;  %v899_v41 = vld [vmem:[#allocation7 + $0x8] sm:$0xff]   ;;  %v902_v44 = vld [vmem:[#allocation7 + $0xd0] sm:$0xff]   ;;  %v164_v5 = vsub.s32 0, %v163_v4  ;;  %v172_v6 = vsub.s32 2, %v163_v4  ;;  %v168_v8 = vsub.s32 1, %v163_v4 }
  0x45   :  { %v896_v38 = vld [vmem:[#allocation7 + $0x80] sm:$0xff]   ;;  %v900_v42 = vld [vmem:[#allocation7 + $0x88] sm:$0xff]   ;;  %v903_v45 = vld [vmem:[#allocation7 + $0x10] sm:$0xff]   ;;  %v176_v9 = vsub.s32 3, %v163_v4  ;;  %s717_s9 = sshll.u32 %s1027_s8, 4  ;;  %s718_s9 = int_to_ptr.vmem [resolvable:$true] %s717_s9 }
  0x46   :  { %349 = vmatpush1.bf16.msra.mxu0 %v867_v15  ;;  %390 = vmatpush1.bf16.msra.mxu1 %v868_v16  ;;  %v904_v46 = vld [vmem:[#allocation7 + $0x90] sm:$0xff]   ;;  %v905_v47 = vld [vmem:[#allocation7 + $0x58] sm:$0xff]   ;;  %v909_v51 = vld [vmem:[#allocation7 + $0x60] sm:$0xff]   ;;  %s991_s10 = scalar_lea.vmem %s718_s9, 64  ;;  %p996_p11 = scmp.lt.s32.totalorder %s718_s9, %s718_s9 }
  0x47   :  { %350 = vmatprep.subr.bf16.mxu0 %v869_v17  ;;  %391 = vmatprep.subr.bf16.mxu1 %v871_v18  ;;  %v906_v48 = vld [vmem:[#allocation7 + $0xd8] sm:$0xff]   ;;  %v910_v52 = vld [vmem:[#allocation7 + $0xe0] sm:$0xff]   ;;  %v913_v55 = vld [vmem:[#allocation7 + $0x68] sm:$0xff]   ;;  %p992_p10 = scmp.ne.s32.totalorder %s718_s9, %s991_s10  ;;  %p997_p12 = scmp.lt.s32.totalorder %s991_s10, %s991_s10 }
  0x48   :  { %v907_v49 = vld [vmem:[#allocation7 + $0x18] sm:$0xff]   ;;  %v911_v53 = vld [vmem:[#allocation7 + $0x20] sm:$0xff]   ;;  %v914_v56 = vld [vmem:[#allocation7 + $0xe8] sm:$0xff]  }
  0x49   :  { %v908_v50 = vld [vmem:[#allocation7 + $0x98] sm:$0xff]   ;;  %v912_v54 = vld [vmem:[#allocation7 + $0xa0] sm:$0xff]   ;;  %v915_v57 = vld [vmem:[#allocation7 + $0x28] sm:$0xff]   ;;  %p998_p13 = por %p997_p12, %p996_p11 }
  0x4a   :  { %351 = vmatpush1.bf16.msra.mxu0 %v873_v19  ;;  %392 = vmatpush1.bf16.msra.mxu1 %v874_v20  ;;  %v916_v58 = vld [vmem:[#allocation7 + $0xa8] sm:$0xff]   ;;  %v917_v59 = vld [vmem:[#allocation7 + $0x70] sm:$0xff]   ;;  %v921_v63 = vld [vmem:[#allocation7 + $0x78] sm:$0xff]  }
  0x4b   :  { %352 = vmatprep.subr.bf16.mxu0 %v875_v21  ;;  %393 = vmatprep.subr.bf16.mxu1 %v877_v22  ;;  %v918_v60 = vld [vmem:[#allocation7 + $0xf0] sm:$0xff]   ;;  %v922_v0 = vld [vmem:[#allocation7 + $0xf8] sm:$0xff]   ;;  %p999_p0 = pnand %p998_p13, %p992_p10 }
  0x4c   :  { %v919_v61 = vld [vmem:[#allocation7 + $0x30] sm:$0xff]   ;;  %v923_v1 = vld [vmem:[#allocation7 + $0x38] sm:$0xff]  }
  0x4d   :  { %v920_v62 = vld [vmem:[#allocation7 + $0xb0] sm:$0xff]   ;;  %v924_v2 = vld [vmem:[#allocation7 + $0xb8] sm:$0xff]  }
  0x4e   :  { %353 = vmatpush1.bf16.msra.mxu0 %v879_v23  ;;  %394 = vmatpush1.bf16.msra.mxu1 %v880_v24  ;;  %v93_v7 = vld [vmem:[%s1114_s2] sm:$0xf] }
  0x4f   :  { %354 = vmatprep.subr.bf16.mxu0 %v881_v25  ;;  %395 = vmatprep.subr.bf16.mxu1 %v883_v26  ;;  %v165_v10 = vrot.slane %v93_v7, %v164_v5  ;;  %v173_v11 = vrot.slane %v93_v7, %v172_v6  ;;  %v169_v12 = vrot.slane %v93_v7, %v168_v8 }
  0x50   :  { %v177_v13 = vrot.slane %v93_v7, %v176_v9 }
  0x52   :  { %355 = vmatpush1.bf16.msra.mxu0 %v885_v27  ;;  %396 = vmatpush1.bf16.msra.mxu1 %v886_v28 }
  0x53   :  { %356 = vmatprep.subr.bf16.mxu0 %v887_v29  ;;  %397 = vmatprep.subr.bf16.mxu1 %v889_v30 }
  0x56   :  { %357 = vmatpush1.bf16.msra.mxu0 %v891_v31  ;;  %398 = vmatpush1.bf16.msra.mxu1 %v892_v32 }
  0x57   :  { %792 = vmatprep.subr.bf16.mxu0 %v893_v34  ;;  %814 = vmatprep.subr.bf16.mxu1 %v894_v35 }
  0x59   :  { %375 = vmatmul.mubr.bf16.vlgmr.msra.gmra.mrb[0].mxu0 %v160_v37  ;;  %416 = vmatmul.mubr.bf16.vlgmr.msra.gmra.mrb[0].mxu1 %v160_v37 }
  0x5a   :  { %793 = vmatpush3.bf16.msra.mxu0 %v895_v36  ;;  %815 = vmatpush3.bf16.msra.mxu1 %v896_v38  ;;  %v759_v36 = vld [vmem:[%s1116_s4] ss:$0 sm:$0xff] }
  0x5b   :  { %794 = vmatprep.subr.bf16.mxu0 %v897_v39  ;;  %816 = vmatprep.subr.bf16.mxu1 %v898_v40 }
  0x5e   :  { %795 = vmatpush3.bf16.msra.mxu0 %v899_v41  ;;  %817 = vmatpush3.bf16.msra.mxu1 %v900_v42 }
  0x5f   :  { %796 = vmatprep.subr.bf16.mxu0 %v901_v43  ;;  %818 = vmatprep.subr.bf16.mxu1 %v902_v44 }
  0x62   :  { %797 = vmatpush3.bf16.msra.mxu0 %v903_v45  ;;  %819 = vmatpush3.bf16.msra.mxu1 %v904_v46 }
  0x63   :  { %798 = vmatprep.subr.bf16.mxu0 %v905_v47  ;;  %820 = vmatprep.subr.bf16.mxu1 %v906_v48 }
  0x66   :  { %799 = vmatpush3.bf16.msra.mxu0 %v907_v49  ;;  %821 = vmatpush3.bf16.msra.mxu1 %v908_v50 }
  0x67   :  { %800 = vmatprep.subr.bf16.mxu0 %v909_v51  ;;  %822 = vmatprep.subr.bf16.mxu1 %v910_v52 }
  0x6a   :  { %801 = vmatpush3.bf16.msra.mxu0 %v911_v53  ;;  %823 = vmatpush3.bf16.msra.mxu1 %v912_v54 }
  0x6b   :  { %802 = vmatprep.subr.bf16.mxu0 %v913_v55  ;;  %824 = vmatprep.subr.bf16.mxu1 %v914_v56 }
  0x6e   :  { %803 = vmatpush3.bf16.msra.mxu0 %v915_v57  ;;  %825 = vmatpush3.bf16.msra.mxu1 %v916_v58 }
  0x6f   :  { %804 = vmatprep.subr.bf16.mxu0 %v917_v59  ;;  %826 = vmatprep.subr.bf16.mxu1 %v918_v60 }
  0x72   :  { %805 = vmatpush3.bf16.msra.mxu0 %v919_v61  ;;  %827 = vmatpush3.bf16.msra.mxu1 %v920_v62 }
  0x73   :  { %806 = vmatprep.subr.bf16.mxu0 %v921_v63  ;;  %828 = vmatprep.subr.bf16.mxu1 %v922_v0 }
  0x76   :  { %807 = vmatpush3.bf16.msra.mxu0 %v923_v1  ;;  %829 = vmatpush3.bf16.msra.mxu1 %v924_v2 }
 0x12c   :  { %v376_v14 = vpop.f32.mrb[0].mxu0  ;;  %v417_v15 = vpop.f32.mrb[0].mxu1 }
 0x12d   :  { %v377_v16 = vadd.f32 %v376_v14, %v165_v10  ;;  %v418_v17 = vadd.f32 %v417_v15, %v173_v11  ;;  %v378_v18 = vpop.f32.mrb[1].mxu0  ;;  %v419_v19 = vpop.f32.mrb[1].mxu1 }
 0x12e   :  { %v379_v20 = vadd.f32 %v378_v18, %v169_v12  ;;  %v420_v21 = vadd.f32 %v419_v19, %v177_v13  ;;  %v380_v22 = vpop.f32.mrb[2].mxu0  ;;  %v421_v23 = vpop.f32.mrb[2].mxu1 }
 0x12f   :  { %v424_v24 = vmax.f32 %v377_v16, 0.0  ;;  %v426_v25 = vmax.f32 %v418_v17, 0.0  ;;  %v381_v26 = vpop.f32.mrb[3].mxu0  ;;  %v422_v27 = vpop.f32.mrb[3].mxu1 }
 0x130   :  { %v425_v28 = vmax.f32 %v379_v20, 0.0  ;;  %v427_v29 = vmax.f32 %v420_v21, 0.0 }
 0x131   :  { %v430_v30 = vpack.c.bf16 %v426_v25, %v426_v25  ;;  %v428_v33 = vpack.c.bf16 %v424_v24, %v424_v24 }
 0x132   :  { %v429_v31 = vpack.c.bf16 %v425_v28, %v425_v28  ;;  %v431_v32 = vpack.c.bf16 %v427_v29, %v427_v29 }
 0x134   :  { %662 = vmatprep.mubr.bf16.mxu0 %v429_v31  ;;  %702 = vmatprep.mubr.bf16.mxu1 %v431_v32 }
 0x135   :  { %663 = vmatmul.mubr.bf16.vlgmr.msra.gmra.mrb[4].mxu0 %v428_v33  ;;  %703 = vmatmul.mubr.bf16.vlgmr.msra.gmra.mrb[4].mxu1 %v430_v30 }
 0x208   :  { %v808_v34 = vpop.f32.mrb[4].mxu0  ;;  %v830_v35 = vpop.f32.mrb[4].mxu1 }
 0x209   :  { %v809_v37 = vpop.f32.mrb[5].mxu0  ;;  %v831_v38 = vpop.f32.mrb[5].mxu1 }
 0x20a   :  { %v810_v39 = vadd.f32 %v809_v37, %v808_v34  ;;  %v832_v40 = vadd.f32 %v831_v38, %v830_v35  ;;  %v811_v41 = vpop.f32.mrb[6].mxu0  ;;  %v833_v42 = vpop.f32.mrb[6].mxu1 }
 0x20b   :  { %v812_v43 = vpop.f32.mrb[7].mxu0  ;;  %v834_v44 = vpop.f32.mrb[7].mxu1 }
 0x20c   :  { %v665_v45 = vadd.f32 %v810_v39, %v759_v36 }
 0x20e   :  { %v705_v46 = vadd.f32 %v832_v40, %v665_v45 }
 0x210   :  { %710 = vst [vmem:[#allocation8] sm:$0xf] %v705_v46 }
 0x211   :  { %1002 = shalt.err (!%p999_p0)
}
 0x212   :  { %s1003_s12 = scalar_lea.hbm %s1117_s5, 64 }
 0x213   :  { %p1004_p1 = scmp.ne.s32.totalorder %s1117_s5, %s1003_s12  ;;  %p1007_p2 = scmp.lt.u32.totalorder %s1003_s12, %s1117_s5 }
 0x215   :  { %p1009_p3 = pnand %p1007_p2, %p1004_p1 }
 0x217   :  { %1012 = shalt.err (!%p1009_p3)
}
 0x218   :  { %720 = dma.vmem_to_hbm [thread:$0]  %s718_s9, 64, %s1117_s5, [#allocation4]  }
 0x219   :  { %1017 = dma.done.wait [#allocation4], 64  }
 0x21a   :  { %1018 = vsyncadd [#allocation4], 4294967232 }
 0x21b   :  { %724 = vsyncpa [#allocation3], 1 }
 0x21c   :  { %725 = vsyncpa [#allocation6], 1 }
 0x21d   :  { %726 = vsyncpa [#allocation4], 1 }

</bundles_post_ra>
